<compile_context>
chip_gen: v7x
topology: tpu7x:2x2x1
jax: 0.10.0
libtpu: 0.0.40
codegen_flags: <defaults>
</compile_context>

<pallas_src>
import functools

import jax
import jax.numpy as jnp
import numpy as np
from jax.experimental import pallas as pl
from jax.experimental.pallas import tpu as pltpu

PARAM = 10.0          # delu_feature_map param
EPS = 1e-10           # ILMSPAM eps
_SMALL_CQ = 8         # below this, the Cq contraction is done as VPU outer products
_APPROX_RECIP = True  # set False for an exact-divide PAM normalization fallback
_MAX_UNROLL = 16      # cap on the static in-kernel batch loop (bounds trace size)


def _round_up(v, m):
    return (v + m - 1) // m * m


def _delu(v):
    # param*relu(x) + (exp(param*(x - relu(x))) - 1) + 1 == param*relu(x) + exp(param*min(x,0))
    return PARAM * jnp.maximum(v, 0.0) + jnp.exp(PARAM * jnp.minimum(v, 0.0))


def _mhead_kernel(x_ref, wqkv_ref, bqkv_ref, gpam_ref, gcam_ref, o_ref,
                  *, c, cq, c_pad, cq_pad, n_valid):
    """One grid step processes BB batch elements; all per-batch math is 2-D."""
    w = wqkv_ref[...]                      # (O_pad, C)  fused [V; Q; K] weight
    bias = bqkv_ref[...]                   # (O_pad, 1)
    gpam = gpam_ref[0, 0]
    gcam = gcam_ref[0, 0]
    bb, _, n_tot = x_ref.shape

    lane_ok = None
    if n_valid < n_tot:                    # wrapper padded N up to a multiple of 128
        lane_ok = jax.lax.broadcasted_iota(jnp.int32, (1, n_tot), 1) < n_valid

    for b in range(bb):                    # static unroll over the block-batch
        x = x_ref[b]                       # (C, N) f32

        # fused [V;Q;K] 1x1-conv projection: one MXU matmul + one bias add
        qkv = jnp.dot(w, x, preferred_element_type=jnp.float32) + bias   # (O_pad, N)
        v = qkv[:c, :]                                                    # (C,  N)
        qf = _delu(qkv[c_pad:c_pad + cq, :])                              # (Cq, N) tile-aligned
        kf = _delu(qkv[c_pad + cq_pad:c_pad + cq_pad + cq, :])            # (Cq, N) tile-aligned
        if lane_ok is not None:
            kf = jnp.where(lane_ok, kf, 0.0)       # padded lanes must not feed KV / ksum

        # ---------------- PAM (linear attention branch) ----------------
        kv = gpam * jnp.einsum('mn,cn->mc', kf, v,
                               preferred_element_type=jnp.float32)        # (Cq, C), gamma folded
        ksum = jnp.sum(kf, axis=-1, keepdims=True) + EPS                  # (Cq, 1)
        denom = jnp.sum(qf * ksum, axis=0, keepdims=True)                 # (1,  N)  (> 0)
        if _APPROX_RECIP:
            qf_n = qf * pl.reciprocal(denom, approx=True)                 # norm folded into qf
        else:
            qf_n = qf / denom
        if cq <= _SMALL_CQ:
            # Tiny contraction length -> VPU outer products instead of a padded MXU pass.
            wv_out = kv[0, :, None] * qf_n[0, None, :]                    # (C, N)
            for m in range(1, cq):
                wv_out = wv_out + kv[m, :, None] * qf_n[m, None, :]
        else:
            wv_out = jnp.einsum('mc,mn->cn', kv, qf_n,
                                preferred_element_type=jnp.float32)

        # ---------------- CAM (channel attention branch) ----------------
        energy = jnp.einsum('cn,dn->cd', x, x,
                            preferred_element_type=jnp.float32)           # (C, C)
        # softmax(rowmax(energy) - energy) stabilized == exp(rowmin(energy) - energy)/sum
        e = jnp.exp(jnp.min(energy, axis=-1, keepdims=True) - energy)
        attn = (gcam * e) / jnp.sum(e, axis=-1, keepdims=True)            # gamma folded, tiny (C,C)
        cam = jnp.dot(attn, x, preferred_element_type=jnp.float32)        # (C, N)

        # fused epilogue: pam + cam = 2x + gpam*weight_value + gcam*cam_attn
        o_ref[b] = (2.0 * x + wv_out + cam).astype(o_ref.dtype)


def _chip_config():
    """(single_tensorcore, vmem_limit_bytes) derived from the attached TPU."""
    kind = ""
    try:
        kind = jax.devices()[0].device_kind.lower()
    except Exception:
        pass
    # v5e / v6e ("lite") chips: one TensorCore, 128 MiB physical VMEM.
    single_tc = ("lite" in kind) or ("v5e" in kind) or ("v6e" in kind)
    vmem_limit = (96 if single_tc else 48) * 1024 * 1024   # conservative for v7x/unknown
    try:
        cap = int(pltpu.get_tpu_info().vmem_capacity_bytes)
        vmem_limit = max(min(vmem_limit, cap - 16 * 1024 * 1024), cap // 2)
    except Exception:
        pass
    return single_tc, int(vmem_limit)


def _choose_block_batch(batch, c, n_pad, single_tc, vmem_limit):
    """Largest BB that (a) divides B, (b) on multi-TC chips keeps >= 2 grid steps,
    (c) keeps ~12 live f32 (C, N) slabs per batch (incl. double-buffered I/O blocks)
    inside half the scoped VMEM limit, and (d) keeps the static unroll bounded."""
    per_batch = c * n_pad * 4
    budget = vmem_limit // 2
    best = 1
    for cand in range(1, min(batch, _MAX_UNROLL) + 1):
        if batch % cand:
            continue
        if (not single_tc) and batch >= 2 and batch // cand < 2:
            break                         # keep both v7x TensorCores fed
        if cand * per_batch * 12 > budget:
            break
        best = cand
    return best


def mhead_forward(x_ncwh, params):
    wq, bq, wk, bk, wv, bv, gpam, gcam = params
    B, C, W, H = x_ncwh.shape
    N = W * H
    Cq = wq.shape[0]

    # --- fused, sublane-padded [value; query; key] projection weight / bias ---
    C_pad = _round_up(C, 8)
    Cq_pad = _round_up(Cq, 8)
    O_pad = C_pad + 2 * Cq_pad

    def _pad_rows(a, rows):
        a = a.astype(jnp.float32)
        return jnp.pad(a, ((0, rows - a.shape[0]),) + ((0, 0),) * (a.ndim - 1))

    wqkv = jnp.concatenate([_pad_rows(wv, C_pad),
                            _pad_rows(wq, Cq_pad),
                            _pad_rows(wk, Cq_pad)], axis=0)                   # (O_pad, C)
    bqkv = jnp.concatenate([_pad_rows(bv, C_pad),
                            _pad_rows(bq, Cq_pad),
                            _pad_rows(bk, Cq_pad)], axis=0).reshape(O_pad, 1)  # (O_pad, 1)

    # --- lane padding: keep the last dim a multiple of 128 (unmasked stores) ---
    N_pad = _round_up(N, 128)
    xf = x_ncwh.reshape(B, C, N).astype(jnp.float32)
    if N_pad != N:
        xf = jnp.pad(xf, ((0, 0), (0, 0), (0, N_pad - N)))

    single_tc, vmem_limit = _chip_config()
    BB = _choose_block_batch(B, C, N_pad, single_tc, vmem_limit)
    grid = (B // BB,)

    flops = 2 * B * N_pad * (O_pad * C + 2 * Cq * C + 2 * C * C)
    transcendentals = B * (2 * Cq * N_pad + C * C + N_pad)
    bytes_accessed = 2 * B * C * N_pad * 4 + (O_pad * C + O_pad + 2) * 4

    out = pl.pallas_call(
        functools.partial(_mhead_kernel, c=C, cq=Cq, c_pad=C_pad, cq_pad=Cq_pad, n_valid=N),
        out_shape=jax.ShapeDtypeStruct((B, C, N_pad), jnp.float32),
        grid_spec=pltpu.PrefetchScalarGridSpec(
            num_scalar_prefetch=0,
            grid=grid,
            in_specs=[
                pl.BlockSpec((BB, C, N_pad), lambda b: (b, 0, 0)),
                pl.BlockSpec((O_pad, C), lambda b: (0, 0)),
                pl.BlockSpec((O_pad, 1), lambda b: (0, 0)),
                pl.BlockSpec((1, 1), lambda b: (0, 0),
                             memory_space=pltpu.MemorySpace.SMEM),
                pl.BlockSpec((1, 1), lambda b: (0, 0),
                             memory_space=pltpu.MemorySpace.SMEM),
            ],
            out_specs=pl.BlockSpec((BB, C, N_pad), lambda b: (b, 0, 0)),
        ),
        compiler_params=pltpu.CompilerParams(
            dimension_semantics=("parallel",),
            vmem_limit_bytes=vmem_limit,
        ),
        cost_estimate=pl.CostEstimate(
            flops=int(flops),
            transcendentals=int(transcendentals),
            bytes_accessed=int(bytes_accessed),
        ),
    )(xf, wqkv, bqkv,
      gpam.reshape(1, 1).astype(jnp.float32),
      gcam.reshape(1, 1).astype(jnp.float32))

    if N_pad != N:
        out = out[:, :, :N]
    # NOTE: the PyTorch module implicitly requires W == H (it adds a (B,C,H,W)
    # view back onto a (B,C,W,H) tensor); the flat-N treatment matches it there.
    return out.reshape(B, C, W, H)


# ---------------- pure-JAX reference (mirrors the PyTorch forward) ----------------
def _delu_ref(x):
    x1 = jnp.maximum(x, 0.0)
    x2 = x - x1
    return PARAM * x1 + (jnp.exp(PARAM * x2) - 1.0) + 1.0


def ref_forward(x_ncwh, params):
    wq, bq, wk, bk, wv, bv, gpam, gcam = params
    B, C, W, H = x_ncwh.shape
    N = W * H
    hp = jax.lax.Precision.HIGHEST
    xf = x_ncwh.reshape(B, C, N)
    # PAM
    Q = jnp.einsum('oc,bcn->bon', wq, xf, precision=hp) + bq[None, :, None]
    K = jnp.einsum('oc,bcn->bon', wk, xf, precision=hp) + bk[None, :, None]
    V = jnp.einsum('oc,bcn->bon', wv, xf, precision=hp) + bv[None, :, None]
    Qf = _delu_ref(Q).transpose(0, 2, 1)                                  # (B, N, Cq)
    Kf = _delu_ref(K)                                                     # (B, Cq, N)
    KV = jnp.einsum('bmn,bcn->bmc', Kf, V, precision=hp)
    norm = 1.0 / jnp.einsum('bnc,bc->bn', Qf, jnp.sum(Kf, -1) + EPS, precision=hp)
    weight_value = jnp.einsum('bnm,bmc,bn->bcn', Qf, KV, norm, precision=hp)
    pam = xf + gpam[0] * weight_value
    # CAM
    energy = jnp.einsum('bcn,bdn->bcd', xf, xf, precision=hp)
    energy_new = jnp.max(energy, -1, keepdims=True) - energy
    attn = jax.nn.softmax(energy_new, axis=-1)
    cam = gcam[0] * jnp.einsum('bcd,bdn->bcn', attn, xf, precision=hp) + xf
    return (pam + cam).reshape(B, C, W, H)


if __name__ == "__main__":
    key = jax.random.PRNGKey(0)

    def make_case(k, B, C, W, H, scale=8):
        Cq = max(C // scale, 1)
        ks = jax.random.split(k, 7)
        x = jax.random.normal(ks[0], (B, C, W, H), jnp.float32)
        wq = 0.1 * jax.random.normal(ks[1], (Cq, C), jnp.float32)   # query_conv 1x1
        bq = 0.1 * jax.random.normal(ks[2], (Cq,), jnp.float32)
        wk = 0.1 * jax.random.normal(ks[3], (Cq, C), jnp.float32)   # key_conv 1x1
        bk = 0.1 * jax.random.normal(ks[4], (Cq,), jnp.float32)
        wv = 0.1 * jax.random.normal(ks[5], (C, C), jnp.float32)    # value_conv 1x1
        bv = 0.1 * jax.random.normal(ks[6], (C,), jnp.float32)
        # gammas are zero-init Parameters in __init__; use nonzero values so both
        # attention branches actually contribute to the verified output.
        gpam = jnp.array([0.5], jnp.float32)
        gcam = jnp.array([0.25], jnp.float32)
        return x, (wq, bq, wk, bk, wv, bv, gpam, gcam)

    k1, k2 = jax.random.split(key)

    # primary case: in_channels=16, scale=8 (Cq=2), W*H = 256 (lane-aligned)
    x, params = make_case(k1, B=2, C=16, W=16, H=16)
    out = jax.block_until_ready(mhead_forward(x, params))
    np.testing.assert_allclose(np.asarray(out), np.asarray(ref_forward(x, params)),
                               rtol=2e-3, atol=2e-3)

    # unaligned spatial case: W*H = 144 -> exercises the N-padding + K-mask path
    x2, params2 = make_case(k2, B=2, C=16, W=12, H=12)
    out2 = jax.block_until_ready(mhead_forward(x2, params2))
    np.testing.assert_allclose(np.asarray(out2), np.asarray(ref_forward(x2, params2)),
                               rtol=2e-3, atol=2e-3)

    print("KERNEL_OK")
</pallas_src>

<mosaic_0001>
module attributes {stable_mosaic.version = 11 : i64} {
  func.func @_mhead_kernel(%arg0: i32, %arg1: memref<1x16x256xf32, #tpu.memory_space<vmem>>, %arg2: memref<32x16xf32, #tpu.memory_space<vmem>>, %arg3: memref<32x1xf32, #tpu.memory_space<vmem>>, %arg4: memref<1x1xf32, #tpu.memory_space<smem>>, %arg5: memref<1x1xf32, #tpu.memory_space<smem>>, %arg6: memref<1x16x256xf32, #tpu.memory_space<vmem>>) attributes {dimension_semantics = [#tpu.dimension_semantics<parallel>], iteration_bounds = array<i64: 2>, scalar_prefetch = 0 : i64, scratch_operands = 0 : i64, tpu.core_type = #tpu.core_type<tc>, window_params = [{transform_indices = @transform_0, window_bounds = array<i64: 1, 16, 256>}, {pipeline_mode = #tpu.pipeline_mode<synchronous>, transform_indices = @transform_1, window_bounds = array<i64: 32, 16>}, {pipeline_mode = #tpu.pipeline_mode<synchronous>, transform_indices = @transform_2, window_bounds = array<i64: 32, 1>}, {transform_indices = @transform_3, window_bounds = array<i64: 1, 1>}, {transform_indices = @transform_4, window_bounds = array<i64: 1, 1>}, {transform_indices = @transform_5, window_bounds = array<i64: 1, 16, 256>}]} {
    %c0 = arith.constant 0 : index
    %c0_0 = arith.constant 0 : index
    %0 = vector.load %arg2[%c0, %c0_0] : memref<32x16xf32, #tpu.memory_space<vmem>>, vector<32x16xf32>
    %c0_1 = arith.constant 0 : index
    %c0_2 = arith.constant 0 : index
    %1 = vector.load %arg3[%c0_1, %c0_2] : memref<32x1xf32, #tpu.memory_space<vmem>>, vector<32x1xf32>
    %c0_3 = arith.constant 0 : index
    %c0_4 = arith.constant 0 : index
    %2 = memref.load %arg4[%c0_3, %c0_4] : memref<1x1xf32, #tpu.memory_space<smem>>
    %c0_5 = arith.constant 0 : index
    %c0_6 = arith.constant 0 : index
    %3 = memref.load %arg5[%c0_5, %c0_6] : memref<1x1xf32, #tpu.memory_space<smem>>
    %c0_7 = arith.constant 0 : index
    %c0_8 = arith.constant 0 : index
    %c0_9 = arith.constant 0 : index
    %4 = vector.load %arg1[%c0_7, %c0_8, %c0_9] : memref<1x16x256xf32, #tpu.memory_space<vmem>>, vector<1x16x256xf32>
    %5 = vector.shape_cast %4 : vector<1x16x256xf32> to vector<16x256xf32>
    %cst = arith.constant dense<0.000000e+00> : vector<32x256xf32>
    %6 = tpu.matmul %0, %5, %cst {dimension_numbers = #tpu.dot_dimension_numbers<[1], [0], [0], [1], [0, 0, 1, 1], [], []>} : vector<32x16xf32>, vector<16x256xf32>, vector<32x256xf32> -> vector<32x256xf32>
    %7 = vector.broadcast %1 : vector<32x1xf32> to vector<32x256xf32>
    %8 = arith.addf %6, %7 : vector<32x256xf32>
    %9 = vector.extract_strided_slice %8 {offsets = [0, 0], sizes = [16, 256], strides = [1, 1]} : vector<32x256xf32> to vector<16x256xf32>
    %10 = vector.extract_strided_slice %8 {offsets = [16, 0], sizes = [2, 256], strides = [1, 1]} : vector<32x256xf32> to vector<2x256xf32>
    %cst_10 = arith.constant 0.000000e+00 : f32
    %11 = vector.broadcast %cst_10 : f32 to vector<2x256xf32>
    %12 = arith.maximumf %10, %11 : vector<2x256xf32>
    %cst_11 = arith.constant 1.000000e+01 : f32
    %13 = vector.broadcast %cst_11 : f32 to vector<2x256xf32>
    %14 = arith.mulf %13, %12 : vector<2x256xf32>
    %cst_12 = arith.constant 0.000000e+00 : f32
    %15 = vector.broadcast %cst_12 : f32 to vector<2x256xf32>
    %16 = arith.minimumf %10, %15 : vector<2x256xf32>
    %cst_13 = arith.constant 1.000000e+01 : f32
    %17 = vector.broadcast %cst_13 : f32 to vector<2x256xf32>
    %18 = arith.mulf %17, %16 : vector<2x256xf32>
    %19 = math.exp %18 : vector<2x256xf32>
    %20 = arith.addf %14, %19 : vector<2x256xf32>
    %21 = vector.extract_strided_slice %8 {offsets = [24, 0], sizes = [2, 256], strides = [1, 1]} : vector<32x256xf32> to vector<2x256xf32>
    %cst_14 = arith.constant 0.000000e+00 : f32
    %22 = vector.broadcast %cst_14 : f32 to vector<2x256xf32>
    %23 = arith.maximumf %21, %22 : vector<2x256xf32>
    %cst_15 = arith.constant 1.000000e+01 : f32
    %24 = vector.broadcast %cst_15 : f32 to vector<2x256xf32>
    %25 = arith.mulf %24, %23 : vector<2x256xf32>
    %cst_16 = arith.constant 0.000000e+00 : f32
    %26 = vector.broadcast %cst_16 : f32 to vector<2x256xf32>
    %27 = arith.minimumf %21, %26 : vector<2x256xf32>
    %cst_17 = arith.constant 1.000000e+01 : f32
    %28 = vector.broadcast %cst_17 : f32 to vector<2x256xf32>
    %29 = arith.mulf %28, %27 : vector<2x256xf32>
    %30 = math.exp %29 : vector<2x256xf32>
    %31 = arith.addf %25, %30 : vector<2x256xf32>
    "tpu.trace_start"() <{level = 10 : i32, message = "mn,cn->mc"}> : () -> ()
    %cst_18 = arith.constant dense<0.000000e+00> : vector<2x16xf32>
    %32 = tpu.matmul %31, %9, %cst_18 {dimension_numbers = #tpu.dot_dimension_numbers<[1], [1], [0], [0], [0, 0, 1, 0], [], []>} : vector<2x256xf32>, vector<16x256xf32>, vector<2x16xf32> -> vector<2x16xf32>
    "tpu.trace_stop"() : () -> ()
    %33 = vector.broadcast %2 : f32 to vector<2x16xf32>
    %34 = arith.mulf %33, %32 : vector<2x16xf32>
    %cst_19 = arith.constant dense<0.000000e+00> : vector<2xf32>
    %35 = vector.multi_reduction <add>, %31, %cst_19 [1] : vector<2x256xf32> to vector<2xf32>
    %36 = vector.shape_cast %35 : vector<2xf32> to vector<2x1xf32>
    %cst_20 = arith.constant 1.000000e-10 : f32
    %37 = vector.broadcast %cst_20 : f32 to vector<2x1xf32>
    %38 = arith.addf %36, %37 : vector<2x1xf32>
    %39 = vector.broadcast %38 : vector<2x1xf32> to vector<2x256xf32>
    %40 = arith.mulf %20, %39 : vector<2x256xf32>
    %cst_21 = arith.constant dense<0.000000e+00> : vector<256xf32>
    %41 = vector.multi_reduction <add>, %40, %cst_21 [0] : vector<2x256xf32> to vector<256xf32>
    %42 = vector.shape_cast %41 : vector<256xf32> to vector<1x256xf32>
    %43 = tpu.reciprocal %42 {approx = true} : vector<1x256xf32> -> vector<1x256xf32>
    %44 = vector.broadcast %43 : vector<1x256xf32> to vector<2x256xf32>
    %45 = arith.mulf %20, %44 : vector<2x256xf32>
    %46 = vector.extract_strided_slice %34 {offsets = [0, 0], sizes = [1, 16], strides = [1, 1]} : vector<2x16xf32> to vector<1x16xf32>
    %47 = vector.shape_cast %46 : vector<1x16xf32> to vector<16xf32>
    %48 = vector.shape_cast %47 : vector<16xf32> to vector<16x1xf32>
    %49 = vector.extract_strided_slice %45 {offsets = [0, 0], sizes = [1, 256], strides = [1, 1]} : vector<2x256xf32> to vector<1x256xf32>
    %50 = vector.shape_cast %49 : vector<1x256xf32> to vector<256xf32>
    %51 = vector.shape_cast %50 : vector<256xf32> to vector<1x256xf32>
    %52 = vector.broadcast %48 : vector<16x1xf32> to vector<16x256xf32>
    %53 = vector.broadcast %51 : vector<1x256xf32> to vector<16x256xf32>
    %54 = arith.mulf %52, %53 : vector<16x256xf32>
    %55 = vector.extract_strided_slice %34 {offsets = [1, 0], sizes = [1, 16], strides = [1, 1]} : vector<2x16xf32> to vector<1x16xf32>
    %56 = vector.shape_cast %55 : vector<1x16xf32> to vector<16xf32>
    %57 = vector.shape_cast %56 : vector<16xf32> to vector<16x1xf32>
    %58 = vector.extract_strided_slice %45 {offsets = [1, 0], sizes = [1, 256], strides = [1, 1]} : vector<2x256xf32> to vector<1x256xf32>
    %59 = vector.shape_cast %58 : vector<1x256xf32> to vector<256xf32>
    %60 = vector.shape_cast %59 : vector<256xf32> to vector<1x256xf32>
    %61 = vector.broadcast %57 : vector<16x1xf32> to vector<16x256xf32>
    %62 = vector.broadcast %60 : vector<1x256xf32> to vector<16x256xf32>
    %63 = arith.mulf %61, %62 : vector<16x256xf32>
    %64 = arith.addf %54, %63 : vector<16x256xf32>
    "tpu.trace_start"() <{level = 10 : i32, message = "cn,dn->cd"}> : () -> ()
    %cst_22 = arith.constant dense<0.000000e+00> : vector<16x16xf32>
    %65 = tpu.matmul %5, %5, %cst_22 {dimension_numbers = #tpu.dot_dimension_numbers<[1], [1], [0], [0], [0, 0, 1, 0], [], []>} : vector<16x256xf32>, vector<16x256xf32>, vector<16x16xf32> -> vector<16x16xf32>
    "tpu.trace_stop"() : () -> ()
    %cst_23 = arith.constant dense<0x7F800000> : vector<16xf32>
    %66 = vector.multi_reduction <minimumf>, %65, %cst_23 [1] : vector<16x16xf32> to vector<16xf32>
    %67 = vector.shape_cast %66 : vector<16xf32> to vector<16x1xf32>
    %68 = vector.broadcast %67 : vector<16x1xf32> to vector<16x16xf32>
    %69 = arith.subf %68, %65 : vector<16x16xf32>
    %70 = math.exp %69 : vector<16x16xf32>
    %71 = vector.broadcast %3 : f32 to vector<16x16xf32>
    %72 = arith.mulf %71, %70 : vector<16x16xf32>
    %cst_24 = arith.constant dense<0.000000e+00> : vector<16xf32>
    %73 = vector.multi_reduction <add>, %70, %cst_24 [1] : vector<16x16xf32> to vector<16xf32>
    %74 = vector.shape_cast %73 : vector<16xf32> to vector<16x1xf32>
    %75 = vector.broadcast %74 : vector<16x1xf32> to vector<16x16xf32>
    %76 = arith.divf %72, %75 : vector<16x16xf32>
    %cst_25 = arith.constant dense<0.000000e+00> : vector<16x256xf32>
    %77 = tpu.matmul %76, %5, %cst_25 {dimension_numbers = #tpu.dot_dimension_numbers<[1], [0], [0], [1], [0, 0, 1, 1], [], []>} : vector<16x16xf32>, vector<16x256xf32>, vector<16x256xf32> -> vector<16x256xf32>
    %cst_26 = arith.constant 2.000000e+00 : f32
    %78 = vector.broadcast %cst_26 : f32 to vector<16x256xf32>
    %79 = arith.mulf %78, %5 : vector<16x256xf32>
    %80 = arith.addf %79, %64 : vector<16x256xf32>
    %81 = arith.addf %80, %77 : vector<16x256xf32>
    %c0_27 = arith.constant 0 : index
    %c0_28 = arith.constant 0 : index
    %c0_29 = arith.constant 0 : index
    %82 = vector.load %arg6[%c0_27, %c0_28, %c0_29] : memref<1x16x256xf32, #tpu.memory_space<vmem>>, vector<1x16x256xf32>
    %83 = vector.shape_cast %82 : vector<1x16x256xf32> to vector<16x256xf32>
    %84 = vector.shape_cast %81 : vector<16x256xf32> to vector<1x16x256xf32>
    tpu.vector_store %arg6[%c0_27, %c0_28, %c0_29], %84 {strides = array<i32>} : memref<1x16x256xf32, #tpu.memory_space<vmem>>, vector<1x16x256xf32>,
    return
  }
  func.func @transform_0(%arg0: i32) -> (i32, i32, i32) {
    %c0_i32 = arith.constant 0 : i32
    %c0_i32_0 = arith.constant 0 : i32
    %c0_i32_1 = arith.constant 0 : i32
    return %arg0, %c0_i32, %c0_i32_0 : i32, i32, i32
  }
  func.func @transform_1(%arg0: i32) -> (i32, i32) {
    %c0_i32 = arith.constant 0 : i32
    %c0_i32_0 = arith.constant 0 : i32
    %c0_i32_1 = arith.constant 0 : i32
    return %c0_i32, %c0_i32_0 : i32, i32
  }
  func.func @transform_2(%arg0: i32) -> (i32, i32) {
    %c0_i32 = arith.constant 0 : i32
    %c0_i32_0 = arith.constant 0 : i32
    %c0_i32_1 = arith.constant 0 : i32
    return %c0_i32, %c0_i32_0 : i32, i32
  }
  func.func @transform_3(%arg0: i32) -> (i32, i32) {
    %c0_i32 = arith.constant 0 : i32
    %c0_i32_0 = arith.constant 0 : i32
    %c0_i32_1 = arith.constant 0 : i32
    return %c0_i32, %c0_i32_0 : i32, i32
  }
  func.func @transform_4(%arg0: i32) -> (i32, i32) {
    %c0_i32 = arith.constant 0 : i32
    %c0_i32_0 = arith.constant 0 : i32
    %c0_i32_1 = arith.constant 0 : i32
    return %c0_i32, %c0_i32_0 : i32, i32
  }
  func.func @transform_5(%arg0: i32) -> (i32, i32, i32) {
    %c0_i32 = arith.constant 0 : i32
    %c0_i32_0 = arith.constant 0 : i32
    %c0_i32_1 = arith.constant 0 : i32
    return %arg0, %c0_i32, %c0_i32_0 : i32, i32, i32
  }
}

</mosaic_0001>

<bundles_post_ra>
// kernel: tpu_custom_call.1
= control target key start
LH: loop header
LB: loop body
LE: loop exit
PB: predicated region body
PF: predicated region fallthrough
CT: control target
= control target key end

     0   :  { %s1206_s0 = inlined_call_operand.vmem [shape: f32[2,16,256], index: 0, kind: input, shape index: {}]   ;;  %s1207_s1 = inlined_call_operand.vmem [shape: f32[32,16], index: 1, kind: input, shape index: {}]   ;;  %s1208_s2 = inlined_call_operand.vmem [shape: f32[32,1], index: 2, kind: input, shape index: {}]   ;;  %s1209_s3 = inlined_call_operand.<no memory space> [shape: f32[1,1], index: 3, kind: input, shape index: {}]   ;;  %s1210_s4 = inlined_call_operand.<no memory space> [shape: f32[1,1], index: 4, kind: input, shape index: {}]   ;;  %s1211_s5 = inlined_call_operand.hbm [shape: f32[2,16,256], index: 5, kind: output, shape index: {}]  }
   0x1   :  { %10 = sst [smem:[#allocation2]] %s1209_s3 }
   0x2   :  { %11 = sst [smem:[#allocation3]] %s1210_s4 }
   0x3   :  { %12 = vsyncpa [#allocation5], 0 }
   0x4   :  { %14 = vsyncpa [#allocation5 + $0x1], 0  ;;  %s1019_s22 = smov 0   ;;  %s1021_s23 = smov 0  }
   0x5   :  { %s1023_s24 = smov 0   ;;  %s1025_s25 = smov 0  }
   0x6 LB: > { %s1040_s3 = sadd.s32 4294967295, %s976_s25   ;;  %s813_s4 = sadd.s32 4294967294, %s976_s25   ;;  %s976_s25 = sphi %s1025_s25, %s1217_s25   ;;  %s972_s24 = sphi %s1023_s24, %s1216_s24   ;;  %s968_s23 = sphi %s1021_s23, %s1215_s23   ;;  %s964_s22 = sphi %s1019_s22, %s1214_s22  }
   0x7   : > { %s1044_s26 = sadd.s32 1, %s976_s25   ;;  %s137_s27 = sadd.s32 1, %s972_s24 }
   0x8   : > { %s134_s28 = ssub.s32 %s976_s25, %s1044_s26  ;;  %p147_p0 = scmp.ne.s32.totalorder %s972_s24, %s968_s23 }
   0x9   : > { %p135_p1 = scmp.eq.s32.totalorder %s134_s28, 0  ;;  %p148_p2 = scmp.eq.s32.totalorder %s1040_s3, 1 }
   0xa   : > { %p153_p3 = scmp.ne.s32.totalorder %s968_s23, %s964_s22  ;;  %p154_p4 = scmp.eq.s32.totalorder %s813_s4, 1 }
   0xb   : > { %s1055_s29 = scalar_select %p135_p1, %s972_s24, %s137_s27  }
   0xc   : > { %p1057_p5 = por %p148_p2, %p147_p0  ;;  %p1061_p6 = por %p154_p4, %p153_p3 }
   0xd   : > { %p816_p7 = scmp.ge.s32.totalorder %s976_s25, 1  ;;  %p192_p8 = scmp.lt.s32.totalorder %s976_s25, 3 }
   0xf   : > { %p193_p9 = pnand %p816_p7, %p192_p8 }
  0x10   : > { %p220_p10 = scmp.lt.s32.totalorder (!%p193_p9), %s1040_s3, 1  ;;  %v978_v0 = vmov (!%p193_p9), 0.0   ;;  %v232_v1 = vld [vmem:[%s1208_s2 + $0x18] sm:$0xff] (!%p193_p9)  ;;  %v979_v2 = vmov (!%p193_p9), 0   ;;  %v230_v3 = vld [vmem:[%s1208_s2 + $0x8] sm:$0xff] (!%p193_p9)  ;;  %v229_v4 = vld [vmem:[%s1208_s2] sm:$0xff] (!%p193_p9) }
  0x11   : > { %196 = sbr.rel (%p193_p9) target bundleno = 1050 (0x41a), region = 40  ;;  %336 = vmatprep.mubr.f32.mxu0 (!%p193_p9), %v978_v0  ;;  %892 = vset.pattern.permute.xlu0 (!%p193_p9), %v979_v2  ;;  %v225_v11 = vld [vmem:[%s1207_s1] sm:$0xff] (!%p193_p9)  ;;  %vm259_vm0 = vcmask (!%p193_p9), 130048   ;;  %v226_v12 = vld [vmem:[%s1207_s1 + $0x8] sm:$0xff] (!%p193_p9)  ;;  %v227_v13 = vld [vmem:[%s1207_s1 + $0x10] sm:$0xff] (!%p193_p9)  ;;  %vm461_vm1 = vcmask (!%p193_p9), 1041408  }
  0x12   : > { %893 = vset.pattern.permute.xlu1 (!%p193_p9), %v979_v2  ;;  %256 = vperm.xlu0 (!%p193_p9), %892, %v232_v1   ;;  %v228_v14 = vld [vmem:[%s1207_s1 + $0x18] sm:$0xff] (!%p193_p9)  ;;  %s233_s8 = sld [smem:[#allocation2]] (!%p193_p9)  ;;  %s832_s16 = sshll.u32 (!%p193_p9), %s1040_s3, 9 }
  0x13   : > { %246 = vperm.xlu1 (!%p193_p9), %893, %v230_v3   ;;  %s234_s11 = sld [smem:[#allocation3]] (!%p193_p9)  ;;  %s1161_s19 = scalar_lea.hbm (!%p193_p9), %s1211_s5, %s832_s16 }
  0x14   : > { %s980_s21 = smov (!%p193_p9), [#allocation4]  }
  0x15   : > { %s918_s4 = sshll.u32 (!%p193_p9), %s980_s21, 4  ;;  %s919_s4 = int_to_ptr.vmem [resolvable:$false] %s918_s4 }
  0x16   : > { %241 = vperm.xlu0 (!%p193_p9), %892, %v229_v4   ;;  %s920_s27 = scalar_lea.vmem (!%p193_p9), %s919_s4, 1024 }
  0x18   : > { %s221_s9 = scalar_select %p220_p10, %s1040_s3, 1 }
  0x1a   : > { %s831_s12 = sshll.u32 %s221_s9, 5 }
  0x1b   : > { %s224_s17 = scalar_lea.vmem %s1206_s0, %s831_s12  ;;  %s217_s12 = sand.u32 1, %s968_s23  }
  0x1c   : > { %v1082_v5 = vld [vmem:[%s224_s17 + $0x8] sm:$0xff]  ;;  %v1084_v6 = vld [vmem:[%s224_s17 + $0x18] sm:$0xff]  ;;  %v1086_v7 = vld [vmem:[%s224_s17] sm:$0xff]  ;;  %s817_s13 = sshll.u32 %s217_s12, 5  ;;  %s1165_s3 = scalar_lea.sflag [#allocation5], %s217_s12 }
  0x1d   : > { %v833_v8 = vpack.c.bf16 %v1084_v6, %v1082_v5  ;;  %v1090_v9 = vld [vmem:[%s224_s17 + $0x10] sm:$0xff]  ;;  %s219_s14 = scalar_lea.vmem [#allocation4], %s817_s13 }
  0x1e   : > { %v835_v10 = vpack.c.bf16 %v1090_v9, %v1086_v7  ;;  %s751_s15 = sshll.u32 %s219_s14, 4  ;;  %s1156_s15 = int_to_ptr.vmem [resolvable:$true] %s751_s15 }
  0x1f   : > { %834 = vmatprep.subr.bf16.mxu0 %v833_v8  ;;  %s914_s20 = scalar_lea.vmem %s1156_s15, 512  ;;  %p921_p0 = scmp.lt.s32.totalorder %s1156_s15, %s919_s4 }
  0x20   : > { %836 = vmatpush1.bf16.msra.mxu0 %v835_v10  ;;  %p915_p11 = scmp.ne.s32.totalorder %s1156_s15, %s914_s20  ;;  %p922_p1 = scmp.lt.s32.totalorder %s920_s27, %s914_s20 }
  0x21   : > { %846 = vmatprep.subr.bf16.mxu0 %v833_v8 }
  0x22   : > { %p916_p12 = pnand %p915_p11, %p1057_p5  ;;  %p923_p2 = por %p922_p1, %p921_p0 }
  0x23   : > { %820 = vmatmul.mubr.msk.f32.vlgmr.msra.gmra.mrb[0].mxu0 %vm259_vm0, %v225_v11 }
  0x24   : > { %342 = vmatprep.mubr.f32.mxu0 %v978_v0  ;;  %848 = vmatpush1.bf16.msra.mxu0 %v835_v10  ;;  %p917_p13 = pneg %p916_p12 }
  0x26   : > { %p924_p3 = pnand %p923_p2, %p917_p13 }
  0x27   : > { %821 = vmatmul.mubr.msk.f32.gmra.mrb[2].mxu0 %vm259_vm0, %v226_v12  ;;  %v459_v12 = vstv %s233_s8 }
  0x28   : > { %348 = vmatprep.mubr.f32.mxu0 %v978_v0 }
  0x2b   : > { %822 = vmatmul.mubr.msk.f32.gmra.mrb[4].mxu0 %vm259_vm0, %v227_v13 }
  0x2c   : > { %354 = vmatprep.mubr.f32.mxu0 %v978_v0 }
  0x2f   : > { %823 = vmatmul.mubr.msk.f32.gmra.mrb[6].mxu0 %vm259_vm0, %v228_v14  ;;  %v231_v14 = vld [vmem:[%s1208_s2 + $0x10] sm:$0xff] }
  0x30   : > { %708 = vmatprep.mubr.f32.mxu0 %v978_v0 }
  0x91   : > { %v257_v15 = vpop.permute.xlu0 %256 }
  0x92   : > { %v247_v19 = vpop.permute.xlu1 %246 }
  0x95   : > { %v242_v18 = vpop.permute.xlu0 %241 }
  0xf6   : > { %v338_v16 = vpop.f32.mrb[0].mxu0 }
  0xf7   : > { %v340_v17 = vpop.f32.mrb[1].mxu0  ;;  %v339_v21 = vadd.f32 %v338_v16, %v242_v18 }
  0xf8   : > { %v341_v24 = vadd.f32 %v340_v17, %v242_v18 }
  0xfa   : > { %v344_v20 = vpop.f32.mrb[2].mxu0 }
  0xfb   : > { %v345_v22 = vadd.f32 %v344_v20, %v247_v19  ;;  %v346_v23 = vpop.f32.mrb[3].mxu0 }
  0xfc   : > { %v347_v25 = vadd.f32 %v346_v23, %v247_v19 }
  0xfd   : > { %v839_v26 = vpack.c.bf16 %v345_v22, %v339_v21  ;;  %v625_v21 = vstv %s234_s11 }
  0xfe   : > { %v1114_v27 = vpop.f32.mrb[4].mxu0  ;;  %v837_v28 = vpack.c.bf16 %v347_v25, %v341_v24 }
  0xff   : > { %v1116_v29 = vpop.f32.mrb[5].mxu0 }
 0x100   : > { %838 = vmatprep.subr.bf16.mxu1 %v837_v28 }
 0x101   : > { %840 = vmatpush1.bf16.xpose.msra.mxu1 %v839_v26 }
 0x102   : > { %v356_v30 = vpop.f32.mrb[6].mxu0  ;;  %842 = vmatprep.subr.bf16.mxu1 %v833_v8 }
 0x103   : > { %v357_v31 = vadd.f32 %v356_v30, %v257_v15  ;;  %v358_v32 = vpop.f32.mrb[7].mxu0 }
 0x104   : > { %v359_v33 = vadd.f32 %v358_v32, %v257_v15 }
 0x105   : > { %v379_v34 = vmin.f32 %v357_v31, 0.0  ;;  %v375_v40 = vmax.f32 %v357_v31, 0.0 }
 0x106   : > { %v380_v35 = vmin.f32 %v359_v33, 0.0  ;;  %v376_v41 = vmax.f32 %v359_v33, 0.0 }
 0x107   : > { %v381_v36 = vmul.f32 10.0, %v379_v34  ;;  %v377_v42 = vmul.f32 10.0, %v375_v40 }
 0x108   : > { %v382_v37 = vmul.f32 10.0, %v380_v35  ;;  %v378_v44 = vmul.f32 10.0, %v376_v41 }
 0x109   : > { %v383_v38 = vmul.f32 1.442695, %v381_v36 }
 0x10a   : > { %v385_v39 = vmul.f32 1.442695, %v382_v37 }
 0x10b   : > { %894 = vpow2.f32 %v383_v38 }
 0x10c   : > { %896 = vpow2.f32 %v385_v39 }
 0x115   : > { %v895_v43 = vpop.eup %894 }
 0x116   : > { %v897_v45 = vpop.eup %896  ;;  %v387_v46 = vadd.f32 %v895_v43, %v377_v42 }
 0x117   : > { %v388_v47 = vadd.f32 %v897_v45, %v378_v44 }
 0x118   : > { %v462_v48 = vsel %vm461_vm1, %v387_v46, 0.0 }
 0x119   : > { %453 = vmatprep.mubr.f32.mxu1 %v388_v47  ;;  %v463_v49 = vsel %vm461_vm1, %v388_v47, 0.0 }
 0x11a   : > { %454 = vmatmul.mubr.f32.vlgmr.msra.gmra.mrb[0].mxu1 %v387_v46  ;;  %v464_v50 = vadd.f32 %v463_v49, %v462_v48 }
 0x11b   : > { %844 = vmatpush1.bf16.xpose.msra.mxu1 %v835_v10  ;;  %602 = vmatprep.mubr.f32.mxu1 %v1082_v5  ;;  %v488_v10 = vlaneseq }
 0x11d   : > { %v489_v11 = vshrl.u32 %v488_v10, 7 }
 0x11f   : > { %v1131_v15 = vsub.s32 0, %v489_v11  ;;  %v1134_v17 = vsub.s32 1, %v489_v11 }
 0x122   : > { %603 = vmatmul.mubr.f32.vlgmr.msra.gmra.mrb[2].mxu1 %v1086_v7 }
 0x123   : > { %607 = vmatprep.mubr.f32.mxu1 %v1084_v6 }
 0x126   : > { %608 = vmatmul.mubr.f32.gmra.mrb[4].mxu1 %v1090_v9 }
 0x1ed   : > { %v455_v51 = vpop.f32.mrb[0].mxu1 }
 0x1ee   : > { %v457_v52 = vpop.f32.mrb[1].mxu1  ;;  %v460_v13 = vmul.f32 %v459_v12, %v455_v51 }
 0x1f0   : > { %v491_v16 = vrot.slane %v460_v13, %v1131_v15  ;;  %v514_v18 = vrot.slane %v460_v13, %v1134_v17 }
 0x1f5   : > { %v604_v53 = vpop.f32.mrb[2].mxu1 }
 0x1f6   : > { %v606_v54 = vpop.f32.mrb[3].mxu1  ;;  %v613_v55 = vsel %vm259_vm0, %v604_v53, inf }
 0x1f7   : > { %614 = vmin.xlane.f32.xlu1 %v613_v55 }
 0x1f9   : > { %v609_v56 = vpop.f32.mrb[4].mxu1 }
 0x1fa   : > { %v611_v57 = vpop.f32.mrb[5].mxu1  ;;  %v616_v58 = vsel %vm259_vm0, %v609_v56, inf }
 0x1fb   : > { %617 = vmin.xlane.f32.xlu0 %v616_v58 }
 0x284   : > { %v615_v59 = vpop.xlane.xlu1 %614 }
 0x285   : > { %v619_v60 = vsub.f32 %v615_v59, %v604_v53 }
 0x287   : > { %v621_v61 = vmul.f32 1.442695, %v619_v60 }
 0x288   : > { %v618_v62 = vpop.xlane.xlu0 %617 }
 0x289   : > { %898 = vpow2.f32 %v621_v61  ;;  %v620_v63 = vsub.f32 %v618_v62, %v609_v56 }
 0x28b   : > { %v623_v1 = vmul.f32 1.442695, %v620_v63 }
 0x28d   : > { %900 = vpow2.f32 %v623_v1 }
 0x293   : > { %v899_v2 = vpop.eup %898 }
 0x294   : > { %v628_v3 = vsel %vm259_vm0, %v899_v2, 0.0  ;;  %v626_v22 = vmul.f32 %v899_v2, %v625_v21 }
 0x295   : > { %629 = vadd.xlane.f32.xlu0 %v628_v3 }
 0x297   : > { %v901_v4 = vpop.eup %900 }
 0x298   : > { %v631_v8 = vsel %vm259_vm0, %v901_v4, 0.0  ;;  %v627_v25 = vmul.f32 %v901_v4, %v625_v21 }
 0x299   : > { %632 = vadd.xlane.f32.xlu1 %v631_v8 }
 0x29d   : > { %465 = vadd.xlane.f32.xlu1 %v464_v50 }
 0x2ab   : > { %251 = vperm.xlu0 %892, %v231_v14  }
 0x2ae   : > { %493 = vbcast.lane.b32.xlu1 %v491_v16, 256 }
 0x2af   : > { %497 = vbcast.lane.b32.xlu0 %v491_v16, 264 }
 0x2b2   : > { %516 = vbcast.lane.b32.xlu1 %v514_v18, 256 }
 0x2b3   : > { %520 = vbcast.lane.b32.xlu0 %v514_v18, 264 }
 0x322   : > { %v630_v19 = vpop.xlane.xlu0 %629 }
 0x323   : > { %902 = vrcp.f32 %v630_v19 }
 0x326   : > { %v633_v20 = vpop.xlane.xlu1 %632 }
 0x327   : > { %904 = vrcp.f32 %v633_v20 }
 0x32a   : > { %v252_v30 = vpop.permute.xlu0 %251  ;;  %v466_v43 = vpop.xlane.xlu1 %465 }
 0x32b   : > { %v351_v31 = vadd.f32 %v1114_v27, %v252_v30  ;;  %v353_v32 = vadd.f32 %v1116_v29, %v252_v30  ;;  %v467_v27 = vadd.f32 1e-10, %v466_v43 }
 0x32d   : > { %v903_v23 = vpop.eup %902  ;;  %v365_v33 = vmin.f32 %v351_v31, 0.0  ;;  %v366_v34 = vmin.f32 %v353_v32, 0.0  ;;  %v361_v39 = vmax.f32 %v351_v31, 0.0  ;;  %v362_v40 = vmax.f32 %v353_v32, 0.0 }
 0x32e   : > { %v635_v24 = vmul.f32 %v903_v23, %v626_v22  ;;  %v494_v2 = vpop.permute.xlu1 %493  ;;  %v498_v11 = vpop.permute.xlu0 %497  ;;  %v723_v31 = vmul.f32 2.0, %v1090_v9 }
 0x32f   : > { %v367_v35 = vmul.f32 10.0, %v365_v33  ;;  %v368_v36 = vmul.f32 10.0, %v366_v34  ;;  %v363_v42 = vmul.f32 10.0, %v361_v39  ;;  %v364_v44 = vmul.f32 10.0, %v362_v40 }
 0x330   : > { %824 = vmatmul.mubr.msk.f32.vlgmr.msra.gmra.mrb[8].mxu0 %vm259_vm0, %v635_v24  ;;  %v721_v24 = vmul.f32 2.0, %v1086_v7 }
 0x331   : > { %v905_v26 = vpop.eup %904  ;;  %714 = vmatprep.mubr.f32.mxu0 %v978_v0  ;;  %v369_v37 = vmul.f32 1.442695, %v367_v35  ;;  %v371_v38 = vmul.f32 1.442695, %v368_v36  ;;  %v724_v35 = vmul.f32 2.0, %v1084_v6 }
 0x332   : > { %v637_v28 = vmul.f32 %v905_v26, %v627_v25  ;;  %v517_v13 = vpop.permute.xlu1 %516  ;;  %v521_v20 = vpop.permute.xlu0 %520 }
 0x333   : > { %906 = vpow2.f32 %v369_v37 }
 0x334   : > { %825 = vmatmul.mubr.msk.f32.gmra.mrb[10].mxu0 %vm259_vm0, %v637_v28  ;;  %908 = vpow2.f32 %v371_v38 }
 0x33d   : > { %v907_v41 = vpop.eup %906 }
 0x33e   : > { %v909_v0 = vpop.eup %908  ;;  %v373_v45 = vadd.f32 %v907_v41, %v363_v42 }
 0x33f   : > { %v374_v46 = vadd.f32 %v909_v0, %v364_v44 }
 0x340   : > { %v468_v47 = vmul.f32 %v467_v27, %v373_v45 }
 0x341   : > { %v469_v29 = vmul.f32 %v467_v27, %v374_v46 }
 0x342   : > { %v470_v48 = vsel %vm461_vm1, %v468_v47, 0.0 }
 0x343   : > { %v477_v49 = vsel %vm461_vm1, %v469_v29, 0.0  ;;  %v471_v50 = vrot.slane %v470_v48, 4 }
 0x344   : > { %v478_v51 = vrot.slane %v477_v49, 4 }
 0x345   : > { %v472_v52 = vadd.f32 %v471_v50, %v470_v48 }
 0x346   : > { %v479_v53 = vadd.f32 %v478_v51, %v477_v49 }
 0x347   : > { %v473_v54 = vrot.slane %v472_v52, 2 }
 0x348   : > { %v480_v55 = vrot.slane %v479_v53, 2 }
 0x349   : > { %v474_v56 = vadd.f32 %v473_v54, %v472_v52 }
 0x34a   : > { %v481_v57 = vadd.f32 %v480_v55, %v479_v53 }
 0x34b   : > { %v475_v58 = vrot.slane %v474_v56, 1 }
 0x34c   : > { %v482_v59 = vrot.slane %v481_v57, 1 }
 0x34d   : > { %v476_v60 = vadd.f32 %v475_v58, %v474_v56 }
 0x34e   : > { %v483_v61 = vadd.f32 %v482_v59, %v481_v57 }
 0x34f   : > { %910 = vrcp.f32 %v476_v60 }
 0x350   : > { %912 = vrcp.f32 %v483_v61 }
 0x359   : > { %v911_v62 = vpop.eup %910 }
 0x35a   : > { %v913_v63 = vpop.eup %912  ;;  %v486_v1 = vmul.f32 %v911_v62, %v373_v45 }
 0x35b   : > { %v487_v3 = vmul.f32 %v913_v63, %v374_v46 }
 0x35c   : > { %v502_v4 = vrot.slane %v486_v1, %v1131_v15  ;;  %v525_v8 = vrot.slane %v486_v1, %v1134_v17 }
 0x35d   : > { %v506_v10 = vrot.slane %v487_v3, %v1131_v15  ;;  %v529_v12 = vrot.slane %v487_v3, %v1134_v17  ;;  %v722_v15 = vmul.f32 2.0, %v1082_v5 }
 0x35e   : > { %v507_v14 = vmul.f32 %v502_v4, %v494_v2  ;;  %v530_v16 = vmul.f32 %v525_v8, %v517_v13  ;;  %v509_v21 = vmul.f32 %v502_v4, %v498_v11  ;;  %v532_v23 = vmul.f32 %v525_v8, %v521_v20 }
 0x35f   : > { %v508_v18 = vmul.f32 %v506_v10, %v494_v2  ;;  %v531_v19 = vmul.f32 %v529_v12, %v517_v13  ;;  %v510_v25 = vmul.f32 %v506_v10, %v498_v11  ;;  %v533_v28 = vmul.f32 %v529_v12, %v521_v20 }
 0x360   : > { %v534_v22 = vadd.f32 %v530_v16, %v507_v14  ;;  %v536_v17 = vadd.f32 %v532_v23, %v509_v21 }
 0x361   : > { %v535_v26 = vadd.f32 %v531_v19, %v508_v18  ;;  %v537_v32 = vadd.f32 %v533_v28, %v510_v25 }
 0x362   : > { %v725_v30 = vadd.f32 %v721_v24, %v534_v22  ;;  %v727_v5 = vadd.f32 %v723_v31, %v536_v17 }
 0x363   : > { %v726_v34 = vadd.f32 %v722_v15, %v535_v26  ;;  %v728_v39 = vadd.f32 %v724_v35, %v537_v32 }
 0x403   : > { %v710_v33 = vpop.f32.mrb[8].mxu0 }
 0x404   : > { %v729_v36 = vadd.f32 %v725_v30, %v710_v33  ;;  %v712_v37 = vpop.f32.mrb[9].mxu0 }
 0x405   : > { %v730_v7 = vadd.f32 %v726_v34, %v712_v37 }
 0x406   : > { %733 = vst [vmem:[%s219_s14] sm:$0xff] %v729_v36 }
 0x407   : > { %734 = vst [vmem:[%s219_s14 + $0x8] sm:$0xff] %v730_v7  ;;  %v716_v38 = vpop.f32.mrb[10].mxu0 }
 0x408   : > { %v731_v9 = vadd.f32 %v727_v5, %v716_v38  ;;  %v718_v6 = vpop.f32.mrb[11].mxu0 }
 0x409   : > { %v732_v40 = vadd.f32 %v728_v39, %v718_v6 }
 0x40a   : > { %735 = vst [vmem:[%s219_s14 + $0x10] sm:$0xff] %v731_v9 }
 0x40b   : > { %736 = vst [vmem:[%s219_s14 + $0x18] sm:$0xff] %v732_v40 }
 0x40c   : > { %927 = shalt.err (!%p924_p3)
}
 0x40d   : > { %s928_s28 = scalar_lea.hbm %s1161_s19, 512  ;;  %s932_s9 = scalar_lea.hbm %s1211_s5, 1024 }
 0x40e   : > { %p929_p4 = scmp.ne.s32.totalorder %s1161_s19, %s928_s28  ;;  %p933_p9 = scmp.lt.u32.totalorder %s1161_s19, %s1211_s5 }
 0x40f   : > { %p934_p10 = scmp.lt.u32.totalorder %s932_s9, %s928_s28  ;;  %p936_p12 = scmp.lt.u32.totalorder %s928_s28, %s1161_s19 }
 0x410   : > { %p930_p7 = pnand %p929_p4, %p1057_p5 }
 0x411   : > { %p935_p11 = por %p934_p10, %p933_p9 }
 0x412   : > { %p931_p8 = pneg %p930_p7 }
 0x413   : > { %p937_p13 = por %p936_p12, %p935_p11 }
 0x415   : > { %p938_p0 = pnand %p937_p13, %p931_p8 }
 0x417   : > { %941 = shalt.err (!%p938_p0)
}
 0x418   : > { %s981_s12 = smov 256   ;;  %s982_s13 = smov 16  }
 0x419   : > { %849 = dma.vmem_to_hbm [thread:$0]  (%p1057_p5), %s1156_s15, 512, %s1161_s19, %s1165_s3, %s981_s12, %s981_s12, %s982_s13  }
 0x41a PF: > { %p855_p1 = scmp.ge.s32.totalorder %s976_s25, 2  ;;  %s766_s14 = sand.u32 1, %s964_s22  }
 0x41b   : > { %s767_s16 = scalar_lea.sflag [#allocation5], %s766_s14 }
 0x41c   : > { %p852_p2 = pnand %p855_p1, %p1061_p6 }
 0x41e   : > { %959 = dma.done.wait (!%p852_p2), %s767_s16, 512  }
 0x41f   : > { %961 = vsyncadd (!%p852_p2), %s767_s16, 4294966784  ;;  %p17_p3 = scmp.ge.s32.totalorder %s1044_s26, 4   ;;  %s1214_s22 = smov %s968_s23 }
 0x420   : > { %s1215_s23 = smov %s972_s24  ;;  %s1216_s24 = smov %s1055_s29 }
 0x421   : > { %s1217_s25 = smov %s1044_s26  ;;  %19 = sbr.rel (!%p17_p3) target bundleno = 6 (0x6), region = 75 }
 0x428   :  { %772 = vsyncpa [#allocation5], 1 }
 0x429   :  { %774 = vsyncpa [#allocation5 + $0x1], 1 }

</bundles_post_ra>
